<compile_context>
chip_gen: v6e
topology: v6e:2x2x1
jax: 0.10.0
libtpu: 0.0.40
codegen_flags: <defaults>
</compile_context>

<pallas_src>
import functools
import math

import numpy as np
import jax
import jax.numpy as jnp
from jax.experimental import pallas as pl
from jax.experimental.pallas import tpu as pltpu


# ----------------------------------------------------------------------------
# Motion kernel construction (plain JAX glue, mirrors kornia.get_motion_kernel3d)
# ----------------------------------------------------------------------------
def _angle_axis_to_rotation_matrix(aa: jnp.ndarray) -> jnp.ndarray:
    """Rodrigues formula; aa is a 3-vector (radians)."""
    theta2 = jnp.sum(aa * aa)
    theta = jnp.sqrt(theta2)
    safe = theta > 1e-6
    k = jnp.where(safe, aa / jnp.where(safe, theta, 1.0), jnp.zeros_like(aa))
    K = jnp.array(
        [[0.0, -k[2], k[1]],
         [k[2], 0.0, -k[0]],
         [-k[1], k[0], 0.0]],
        dtype=aa.dtype,
    )
    R = jnp.eye(3, dtype=aa.dtype) + jnp.sin(theta) * K + (1.0 - jnp.cos(theta)) * (K @ K)
    return jnp.where(safe, R, jnp.eye(3, dtype=aa.dtype))


def get_motion_kernel3d(kernel_size: int, angle, direction, mode: str = "nearest"):
    """Build the (ks, ks, ks) motion-blur kernel (single element, no batch)."""
    if not (isinstance(kernel_size, int) and kernel_size % 2 == 1 and kernel_size >= 3):
        raise ValueError(f"kernel_size must be an odd int >= 3, got {kernel_size}")
    if mode not in ("nearest", "bilinear"):
        raise ValueError(f"mode must be 'nearest' or 'bilinear', got {mode}")
    ks = kernel_size
    f32 = jnp.float32

    # direction in [-1, 1] -> [0, 1]; element-wise linspace from d to (1 - d)
    d = (jnp.clip(jnp.asarray(direction, f32), -1.0, 1.0) + 1.0) / 2.0
    line = jnp.stack([d + ((1.0 - 2.0 * d) / (ks - 1)) * i for i in range(ks)])
    kern = jnp.zeros((ks, ks, ks), f32).at[ks // 2, ks // 2, :].set(line)

    # rotate the kernel about its center by (yaw, pitch, roll) degrees
    # (axis-angle rotation of the deg2rad'd angle triplet, nearest resampling).
    angles = jnp.deg2rad(jnp.asarray(angle, f32))
    R = _angle_axis_to_rotation_matrix(angles)
    c = (ks - 1) / 2.0
    zz, yy, xx = jnp.meshgrid(jnp.arange(ks), jnp.arange(ks), jnp.arange(ks), indexing="ij")
    dst = jnp.stack([xx, yy, zz], axis=-1).astype(f32) - c     # (ks,ks,ks,3) xyz
    # TODO(synk): verify R vs R^T / xyz axis ordering against kornia's warp_affine3d.
    src = dst @ R + c                                          # inverse-warp dst -> src

    if mode == "nearest":
        sx = jnp.round(src[..., 0]).astype(jnp.int32)
        sy = jnp.round(src[..., 1]).astype(jnp.int32)
        sz = jnp.round(src[..., 2]).astype(jnp.int32)
        valid = (sx >= 0) & (sx < ks) & (sy >= 0) & (sy < ks) & (sz >= 0) & (sz < ks)
        vals = kern[jnp.clip(sz, 0, ks - 1), jnp.clip(sy, 0, ks - 1), jnp.clip(sx, 0, ks - 1)]
        rotated = jnp.where(valid, vals, 0.0)
    else:
        # TODO(synk): bilinear kernel-rotation resampling not implemented
        # (module default is 'nearest').
        raise NotImplementedError("only mode='nearest' is implemented")

    # Guard against a degenerate rotation that maps the whole line outside the
    # support (0/0 -> NaN in the naive normalization): fall back to a delta.
    s = jnp.sum(rotated)
    delta = jnp.zeros((ks, ks, ks), f32).at[ks // 2, ks // 2, ks // 2].set(1.0)
    return jnp.where(s > 0, rotated / jnp.where(s > 0, s, 1.0), delta)


# ----------------------------------------------------------------------------
# Border-index helpers (match torch.nn.functional.pad semantics)
# ----------------------------------------------------------------------------
_PAD_MODE = {"constant": "constant", "reflect": "reflect",
             "replicate": "edge", "circular": "wrap"}


def _map_axis_np(idx: np.ndarray, n: int, border: str) -> np.ndarray:
    if border in ("constant", "replicate"):   # constant: clamp (update zeroed later)
        return np.clip(idx, 0, n - 1)
    if border == "reflect":
        return np.where(idx < 0, -idx, np.where(idx >= n, 2 * (n - 1) - idx, idx))
    if border == "circular":
        return np.mod(idx, n)
    raise ValueError(border)


def _border_index(i: int, n: int, border: str) -> int:
    if border == "replicate":
        return min(max(i, 0), n - 1)
    if border == "reflect":
        return -i if i < 0 else (2 * (n - 1) - i if i >= n else i)
    if border == "circular":
        return i % n
    raise ValueError(border)


def _round_up(x: int, m: int) -> int:
    return -(-x // m) * m


# ----------------------------------------------------------------------------
# Device / roll-semantics probes (done once, outside any jit trace)
# ----------------------------------------------------------------------------
_DEV = None


def _device_params():
    global _DEV
    if _DEV is not None:
        return _DEV
    kind = ""
    try:
        kind = jax.devices()[0].device_kind.lower()
    except Exception:
        pass
    is_v7 = "v7" in kind
    is_v5e = ("v5 lite" in kind) or ("v5e" in kind) or ("v5litepod" in kind)
    vmem_cap = 0
    try:
        info = pltpu.get_tpu_info()
        vmem_cap = int(getattr(info, "vmem_capacity_bytes", 0) or 0)
    except Exception:
        vmem_cap = 0
    if not vmem_cap:
        vmem_cap = (64 << 20) if is_v7 else (128 << 20)
    _DEV = dict(is_v7=is_v7, is_v5e=is_v5e, cores=2 if is_v7 else 1, vmem_cap=vmem_cap)
    return _DEV


_ROLL_LIKE_JNP = None


def _roll_like_jnp() -> bool:
    """Tiny one-time probe: does pltpu.roll follow jnp.roll's sign convention?"""
    global _ROLL_LIKE_JNP
    if _ROLL_LIKE_JNP is None:
        def k(x_ref, o_ref):
            o_ref[...] = pltpu.roll(x_ref[...], shift=1, axis=0)
        xs = np.arange(8 * 128, dtype=np.float32).reshape(8, 128)
        try:
            out = pl.pallas_call(
                k, out_shape=jax.ShapeDtypeStruct((8, 128), jnp.float32))(jnp.asarray(xs))
            _ROLL_LIKE_JNP = bool(np.array_equal(np.asarray(out), np.roll(xs, 1, axis=0)))
        except Exception:
            _ROLL_LIKE_JNP = True
    return _ROLL_LIKE_JNP


# ----------------------------------------------------------------------------
# Host-side construction of the concatenated band matrix and the depth terms
# ----------------------------------------------------------------------------
def _build_bands_cat(kern3d, H, W, ks, pad, Lp, border):
    """Fold the (ky, kx) taps AND the H/W border handling into a single
    (Lp, ks*Lp) bf16 band matrix (columns grouped per kz plane)."""
    L = H * W
    oh = np.repeat(np.arange(H), W)          # output h per flat index, (L,)
    ow = np.tile(np.arange(W), H)            # output w per flat index, (L,)
    cols = np.arange(L)
    bands = jnp.zeros((ks, L, L), jnp.float32)
    for ky in range(ks):
        for kx in range(ks):
            hs = oh + ky - pad
            ws = ow + kx - pad
            if border == "constant":
                valid = (hs >= 0) & (hs < H) & (ws >= 0) & (ws < W)
            else:
                valid = np.ones(L, dtype=bool)
            rows = _map_axis_np(hs, H, border) * W + _map_axis_np(ws, W, border)
            taps = kern3d[:, ky, kx].astype(jnp.float32)                 # (ks,) over kz
            upd = taps[:, None] * jnp.asarray(valid, jnp.float32)[None, :]
            bands = bands.at[:, rows, cols].add(upd)
    bands = jnp.pad(bands, ((0, 0), (0, Lp - L), (0, Lp - L)))
    return jnp.transpose(bands, (1, 0, 2)).reshape(Lp, ks * Lp).astype(jnp.bfloat16)


def _depth_terms(D, ks, pad, border, T, roll_like_jnp):
    """Depth (kz) mixing as a static list of (kz, roll_amount, mask_col) terms
    plus a (T*D, ncols) f32 row-mask matrix.  The centre plane (shift 0) is
    excluded: it initializes the accumulator directly."""
    TD = T * D
    d = np.arange(TD) % D
    cols, terms = [], []

    def add_term(kz, delta, mask):
        if mask is not None and not mask.any():
            return
        col = None
        if mask is not None and not mask.all():
            col = len(cols)
            cols.append(mask.astype(np.float32))
        amt = (-delta) % TD if roll_like_jnp else delta % TD
        terms.append((kz, int(amt), col))

    for kz in range(ks):
        shift = kz - pad
        if shift == 0:
            continue
        # main term: in-range depth rows, shifted by `shift`
        add_term(kz, shift, (d + shift >= 0) & (d + shift < D))
        # depth-border terms (replicate / reflect / circular only)
        if border != "constant":
            groups = {}
            for dd in range(D):
                if 0 <= dd + shift < D:
                    continue
                src = _border_index(dd + shift, D, border)
                groups.setdefault(src - dd, []).append(dd)
            for delta, dds in groups.items():
                add_term(kz, delta, np.isin(d, np.asarray(dds)))

    ncols = max(1, len(cols))
    M = np.zeros((TD, ncols), np.float32)
    for i, c in enumerate(cols):
        M[:, i] = c
    return tuple(terms), M


# ----------------------------------------------------------------------------
# Pallas kernel: one bf16 MXU matmul + sublane rolls / masked adds for depth
# ----------------------------------------------------------------------------
def _motion_filter_kernel(bands_ref, dsel_ref, x_ref, o_ref, *, Lp, pad, terms):
    # bands_ref: (Lp, ks*Lp) bf16   resident band matrix (ky/kx taps + H/W border)
    # dsel_ref : (T*D, ncols) f32   resident depth row masks
    # x_ref    : (T*D, Lp)          T channel-volumes, rows = (vol, depth)
    # o_ref    : (T*D, Lp)          output block (original input dtype)
    x2 = x_ref[...].astype(jnp.bfloat16)
    y = jnp.dot(x2, bands_ref[...], preferred_element_type=jnp.float32)  # (T*D, ks*Lp)

    # Centre plane (depth shift 0) initializes the sum: no zero-fill pass.
    acc = y[:, pad * Lp:(pad + 1) * Lp]
    for kz, amt, col in terms:                # static python list, unrolled
        yk = y[:, kz * Lp:(kz + 1) * Lp]      # lane-aligned static slice
        if amt:
            yk = pltpu.roll(yk, shift=amt, axis=0)   # sublane roll (XLU)
        if col is not None:
            yk = yk * dsel_ref[:, col:col + 1]       # depth validity / border mask
        acc = acc + yk
    o_ref[...] = acc.astype(o_ref.dtype)      # single lane-dense store


@functools.partial(jax.jit, static_argnames=("border_type", "roll_like_jnp"))
def _filter3d_jit(x, kernel3d, *, border_type, roll_like_jnp):
    dev = _device_params()
    B, C, D, H, W = x.shape
    ks = int(kernel3d.shape[0])
    pad = ks // 2
    L = H * W
    Lp = _round_up(L, 128)                    # lane-dense output stores
    N = B * C
    itemsize = x.dtype.itemsize

    bands_bytes = Lp * ks * Lp * 2            # bf16
    if bands_bytes > (16 << 20):
        # TODO(synk): tile H (folding p-row halos into per-tile band matrices) or
        # switch the in-plane taps to roll+mask VPU adds for very large H*W.
        raise NotImplementedError("H*W too large for single-level band matrices")

    # --- generation-aware block sizing -------------------------------------
    # per-volume VMEM cost per grid step: double-buffered in/out blocks,
    # f32 matmul result (ks planes), f32 accumulator + bf16 LHS temporaries.
    per_vol = D * Lp * (4 * itemsize + 4 * ks + 8)
    budget = (4 << 20) if dev["is_v7"] else (7 << 20)
    min_rows = 128 if dev["is_v5e"] else 256
    T = max(1, budget // per_vol)
    T = max(T, -(-min_rows // D))             # fill the MXU when N allows
    T = min(T, N)
    if dev["cores"] >= 2 and N >= 2:
        T = min(T, -(-N // 2))                # >= 2 grid steps only on 2-TC chips
    mult = 8 // math.gcd(D, 8)
    T = _round_up(T, mult)                    # keep the (T*D, Lp) block 8-aligned
    n_steps = -(-N // T)
    if dev["cores"] >= 2 and n_steps > 1 and (n_steps % 2):
        n_steps += 1                          # even step count across the 2 TCs
    N_pad = n_steps * T
    TD = T * D

    bands = _build_bands_cat(kernel3d, H, W, ks, pad, Lp, border_type)  # (Lp, ks*Lp)
    terms, mask_np = _depth_terms(D, ks, pad, border_type, T, roll_like_jnp)
    dsel = jnp.asarray(mask_np)                                         # (TD, ncols)

    # Free metadata reshape; x stays in its original dtype (bf16 cast in-kernel).
    xf = x.reshape(N * D, L)
    pad_rows = (N_pad - N) * D
    pad_lanes = Lp - L
    if pad_rows or pad_lanes:
        xf = jnp.pad(xf, ((0, pad_rows), (0, pad_lanes)))

    resident = dict(pipeline_mode=pl.Buffered(1)) if dev["is_v7"] else {}
    vmem_limit = int(dev["vmem_cap"] * 3 // 4)

    kern = functools.partial(_motion_filter_kernel, Lp=Lp, pad=pad, terms=terms)
    out = pl.pallas_call(
        kern,
        out_shape=jax.ShapeDtypeStruct((N_pad * D, Lp), x.dtype),
        grid_spec=pltpu.PrefetchScalarGridSpec(
            num_scalar_prefetch=0,
            grid=(n_steps,),
            in_specs=[
                pl.BlockSpec((Lp, ks * Lp), lambda i: (0, 0), **resident),     # bands
                pl.BlockSpec((TD, mask_np.shape[1]), lambda i: (0, 0), **resident),  # masks
                pl.BlockSpec((TD, Lp), lambda i: (i, 0)),                      # x block
            ],
            out_specs=pl.BlockSpec((TD, Lp), lambda i: (i, 0)),
        ),
        compiler_params=pltpu.CompilerParams(
            dimension_semantics=("parallel",),
            vmem_limit_bytes=vmem_limit,
        ),
    )(bands, dsel, xf)
    return out[:N * D, :L].reshape(B, C, D, H, W)


def filter3d_pallas(x: jnp.ndarray, kernel3d: jnp.ndarray, *, border_type: str = "constant"):
    """Depthwise 3D cross-correlation of x (B,C,D,H,W) with kernel3d (k,k,k)."""
    if border_type not in ("constant", "reflect", "replicate", "circular"):
        raise ValueError(f"unsupported border_type: {border_type}")
    _device_params()                 # resolve hardware info outside the trace
    return _filter3d_jit(x, kernel3d, border_type=border_type,
                         roll_like_jnp=_roll_like_jnp())


# ----------------------------------------------------------------------------
# Module equivalent
# ----------------------------------------------------------------------------
class MotionBlur3D:
    def __init__(self, kernel_size: int, angle, direction: float, border_type: str = "constant"):
        self.kernel_size = kernel_size
        if isinstance(angle, float):
            self.angle = (angle, angle, angle)
        elif isinstance(angle, (tuple, list)) and len(angle) == 3:
            self.angle = tuple(angle)
        else:
            raise ValueError(f"Expect angle to be a float or 3-tuple. Got {angle}.")
        self.direction = direction
        assert border_type in ("constant", "reflect", "replicate", "circular")
        self.border_type = border_type

    def __call__(self, x: jnp.ndarray) -> jnp.ndarray:
        kernel = get_motion_kernel3d(self.kernel_size, self.angle, self.direction, mode="nearest")
        return filter3d_pallas(x, kernel, border_type=self.border_type)


# ----------------------------------------------------------------------------
# Pure-JAX reference (exact VPU math, for correctness check)
# ----------------------------------------------------------------------------
def _ref_filter3d(x, kern, border="constant"):
    B, C, D, H, W = x.shape
    ks = kern.shape[0]
    p = ks // 2
    xp = jnp.pad(x, ((0, 0), (0, 0), (p, p), (p, p), (p, p)), mode=_PAD_MODE[border])
    out = jnp.zeros_like(x)
    for kz in range(ks):
        for ky in range(ks):
            for kx in range(ks):
                out = out + kern[kz, ky, kx] * xp[:, :, kz:kz + D, ky:ky + H, kx:kx + W]
    return out


if __name__ == "__main__":
    key = jax.random.PRNGKey(0)
    # small shape consistent with the module's 5D (B, C, D, H, W) input
    x = jax.random.normal(key, (2, 4, 8, 16, 16), dtype=jnp.float32)

    motion_blur = MotionBlur3D(kernel_size=3, angle=35.0, direction=0.5, border_type="constant")
    out = motion_blur(x)
    jax.block_until_ready(out)
    assert out.shape == x.shape

    kernel3d = get_motion_kernel3d(3, (35.0, 35.0, 35.0), 0.5)
    ref = _ref_filter3d(x, kernel3d, "constant")
    assert jnp.allclose(out, ref, rtol=2e-2, atol=2e-2), float(jnp.max(jnp.abs(out - ref)))

    # exercise the in-band / depth-roll border handling too
    out_rep = filter3d_pallas(x, kernel3d, border_type="replicate")
    jax.block_until_ready(out_rep)
    ref_rep = _ref_filter3d(x, kernel3d, "replicate")
    assert jnp.allclose(out_rep, ref_rep, rtol=2e-2, atol=2e-2)

    print("KERNEL_OK")
</pallas_src>

<mosaic_0001>
module attributes {stable_mosaic.version = 11 : i64} {
  func.func @k(%arg0: memref<8x128xf32, #tpu.memory_space<vmem>>, %arg1: memref<8x128xf32, #tpu.memory_space<vmem>>) attributes {dimension_semantics = [], scalar_prefetch = 0 : i64, scratch_operands = 0 : i64, tpu.core_type = #tpu.core_type<tc>} {
    %c0 = arith.constant 0 : index
    %c0_0 = arith.constant 0 : index
    %0 = vector.load %arg0[%c0, %c0_0] : memref<8x128xf32, #tpu.memory_space<vmem>>, vector<8x128xf32>
    %c1_i32 = arith.constant 1 : i32
    %1 = tpu.dynamic_rotate %0 by %c1_i32 dim 0 : vector<8x128xf32>, i32 -> vector<8x128xf32>
    %c0_1 = arith.constant 0 : index
    %c0_2 = arith.constant 0 : index
    %2 = vector.load %arg1[%c0_1, %c0_2] : memref<8x128xf32, #tpu.memory_space<vmem>>, vector<8x128xf32>
    tpu.vector_store %arg1[%c0_1, %c0_2], %1 {strides = array<i32>} : memref<8x128xf32, #tpu.memory_space<vmem>>, vector<8x128xf32>,
    return
  }
}

module attributes {stable_mosaic.version = 11 : i64} {
  func.func @_motion_filter_kernel(%arg0: i32, %arg1: memref<256x768xbf16, #tpu.memory_space<vmem>>, %arg2: memref<64x2xf32, #tpu.memory_space<vmem>>, %arg3: memref<64x256xf32, #tpu.memory_space<vmem>>, %arg4: memref<64x256xf32, #tpu.memory_space<vmem>>) attributes {dimension_semantics = [#tpu.dimension_semantics<parallel>], iteration_bounds = array<i64: 1>, scalar_prefetch = 0 : i64, scratch_operands = 0 : i64, tpu.core_type = #tpu.core_type<tc>, window_params = [{pipeline_mode = #tpu.pipeline_mode<synchronous>, transform_indices = @transform_0, window_bounds = array<i64: 256, 768>}, {pipeline_mode = #tpu.pipeline_mode<synchronous>, transform_indices = @transform_1, window_bounds = array<i64: 64, 2>}, {transform_indices = @transform_2, window_bounds = array<i64: 64, 256>}, {transform_indices = @transform_3, window_bounds = array<i64: 64, 256>}]} {
    %c0 = arith.constant 0 : index
    %c0_0 = arith.constant 0 : index
    %0 = vector.load %arg3[%c0, %c0_0] : memref<64x256xf32, #tpu.memory_space<vmem>>, vector<64x256xf32>
    %1 = arith.truncf %0 : vector<64x256xf32> to vector<64x256xbf16>
    %c0_1 = arith.constant 0 : index
    %c0_2 = arith.constant 0 : index
    %2 = vector.load %arg1[%c0_1, %c0_2] : memref<256x768xbf16, #tpu.memory_space<vmem>>, vector<256x768xbf16>
    %cst = arith.constant dense<0.000000e+00> : vector<64x768xf32>
    %3 = tpu.matmul %1, %2, %cst {dimension_numbers = #tpu.dot_dimension_numbers<[1], [0], [0], [1], [0, 0, 1, 1], [], []>} : vector<64x256xbf16>, vector<256x768xbf16>, vector<64x768xf32> -> vector<64x768xf32>
    %4 = vector.extract_strided_slice %3 {offsets = [0, 256], sizes = [64, 256], strides = [1, 1]} : vector<64x768xf32> to vector<64x256xf32>
    %5 = vector.extract_strided_slice %3 {offsets = [0, 0], sizes = [64, 256], strides = [1, 1]} : vector<64x768xf32> to vector<64x256xf32>
    %c1_i32 = arith.constant 1 : i32
    %6 = tpu.dynamic_rotate %5 by %c1_i32 dim 0 : vector<64x256xf32>, i32 -> vector<64x256xf32>
    %c0_3 = arith.constant 0 : index
    %c0_4 = arith.constant 0 : index
    %7 = vector.load %arg2[%c0_3, %c0_4] : memref<64x2xf32, #tpu.memory_space<vmem>>, vector<64x1xf32>
    %8 = vector.broadcast %7 : vector<64x1xf32> to vector<64x256xf32>
    %9 = arith.mulf %6, %8 : vector<64x256xf32>
    %10 = arith.addf %4, %9 : vector<64x256xf32>
    %11 = vector.extract_strided_slice %3 {offsets = [0, 512], sizes = [64, 256], strides = [1, 1]} : vector<64x768xf32> to vector<64x256xf32>
    %c63_i32 = arith.constant 63 : i32
    %12 = tpu.dynamic_rotate %11 by %c63_i32 dim 0 : vector<64x256xf32>, i32 -> vector<64x256xf32>
    %c0_5 = arith.constant 0 : index
    %c1 = arith.constant 1 : index
    %13 = vector.load %arg2[%c0_5, %c1] : memref<64x2xf32, #tpu.memory_space<vmem>>, vector<64x1xf32>
    %14 = vector.broadcast %13 : vector<64x1xf32> to vector<64x256xf32>
    %15 = arith.mulf %12, %14 : vector<64x256xf32>
    %16 = arith.addf %10, %15 : vector<64x256xf32>
    %c0_6 = arith.constant 0 : index
    %c0_7 = arith.constant 0 : index
    %17 = vector.load %arg4[%c0_6, %c0_7] : memref<64x256xf32, #tpu.memory_space<vmem>>, vector<64x256xf32>
    tpu.vector_store %arg4[%c0_6, %c0_7], %16 {strides = array<i32>} : memref<64x256xf32, #tpu.memory_space<vmem>>, vector<64x256xf32>,
    return
  }
  func.func @transform_0(%arg0: i32) -> (i32, i32) {
    %c0_i32 = arith.constant 0 : i32
    %c0_i32_0 = arith.constant 0 : i32
    %c0_i32_1 = arith.constant 0 : i32
    return %c0_i32, %c0_i32_0 : i32, i32
  }
  func.func @transform_1(%arg0: i32) -> (i32, i32) {
    %c0_i32 = arith.constant 0 : i32
    %c0_i32_0 = arith.constant 0 : i32
    %c0_i32_1 = arith.constant 0 : i32
    return %c0_i32, %c0_i32_0 : i32, i32
  }
  func.func @transform_2(%arg0: i32) -> (i32, i32) {
    %c0_i32 = arith.constant 0 : i32
    %c0_i32_0 = arith.constant 0 : i32
    return %arg0, %c0_i32 : i32, i32
  }
  func.func @transform_3(%arg0: i32) -> (i32, i32) {
    %c0_i32 = arith.constant 0 : i32
    %c0_i32_0 = arith.constant 0 : i32
    return %arg0, %c0_i32 : i32, i32
  }
}

</mosaic_0001>

<bundles_post_ra>
// kernel: tpu_custom_call.1
= control target key start
LH: loop header
LB: loop body
LE: loop exit
PB: predicated region body
PF: predicated region fallthrough
CT: control target
= control target key end

     0   :  { %6 = vsyncpa [#allocation3], 0  ;;  %s103_s0 = inlined_call_operand.hbm [shape: f32[8,128], index: 0, kind: input, shape index: {}]   ;;  %s104_s1 = inlined_call_operand.hbm [shape: f32[8,128], index: 1, kind: output, shape index: {}]  }
   0x1   :  { %7 = vsyncpa [#allocation4], 0  ;;  %s85_s6 = smov [#allocation2]  }
   0x2   :  { %s14_s7 = sshll.u32 %s85_s6, 4  ;;  %s15_s7 = int_to_ptr.vmem [resolvable:$true] %s14_s7 }
   0x3   :  { %s49_s8 = scalar_lea.vmem %s15_s7, 128  ;;  %p54_p1 = scmp.lt.s32.totalorder %s15_s7, %s15_s7 }
   0x4   :  { %p50_p0 = scmp.ne.s32.totalorder %s15_s7, %s49_s8  ;;  %p55_p2 = scmp.lt.s32.totalorder %s49_s8, %s49_s8 }
   0x6   :  { %p56_p3 = por %p55_p2, %p54_p1 }
   0x8   :  { %p57_p4 = pnand %p56_p3, %p50_p0 }
   0xa   :  { %60 = shalt.err (!%p57_p4)
}
   0xb   :  { %17 = dma.hbm_to_vmem [thread:$0]  %s103_s0, 128, %s15_s7, [#allocation3]  }
   0xc   :  { %81 = dma.done.wait [#allocation3], 128  }
   0xd   :  { %82 = vsyncadd [#allocation3], 4294967168  ;;  %s86_s11 = smov [#allocation5]   ;;  %v21_v0 = vld [vmem:[#allocation2] sm:$0xff] }
   0xe   :  { %s30_s12 = sshll.u32 %s86_s11, 4  ;;  %v22_v1 = vrot.slane %v21_v0, 7  ;;  %s31_s12 = int_to_ptr.vmem [resolvable:$true] %s30_s12 }
   0xf   :  { %s61_s13 = scalar_lea.vmem %s31_s12, 128  ;;  %p66_p6 = scmp.lt.s32.totalorder %s31_s12, %s31_s12 }
  0x10   :  { %23 = vst [vmem:[#allocation5] sm:$0xff] %v22_v1  ;;  %p62_p5 = scmp.ne.s32.totalorder %s31_s12, %s61_s13  ;;  %p67_p7 = scmp.lt.s32.totalorder %s61_s13, %s61_s13 }
  0x12   :  { %p68_p8 = por %p67_p7, %p66_p6 }
  0x14   :  { %p69_p9 = pnand %p68_p8, %p62_p5 }
  0x16   :  { %72 = shalt.err (!%p69_p9)
}
  0x17   :  { %33 = dma.vmem_to_hbm [thread:$0]  %s31_s12, 128, %s104_s1, [#allocation4]  }
  0x18   :  { %83 = dma.done.wait [#allocation4], 128  }
  0x19   :  { %84 = vsyncadd [#allocation4], 4294967168 }
  0x1a   :  { %37 = vsyncpa [#allocation3], 1 }
  0x1b   :  { %38 = vsyncpa [#allocation4], 1 }

// kernel: _filter3d_jit.1
= control target key start
LH: loop header
LB: loop body
LE: loop exit
PB: predicated region body
PF: predicated region fallthrough
CT: control target
= control target key end

     0   :  { %v1343_v8 = vmov 0   ;;  %s2046_s0 = inlined_call_operand.vmem [shape: bf16[256,768], index: 0, kind: input, shape index: {}]   ;;  %s2047_s2 = inlined_call_operand.vmem [shape: f32[64,256], index: 2, kind: input, shape index: {}]   ;;  %s2048_s1 = inlined_call_operand.vmem [shape: f32[64,2], index: 1, kind: input, shape index: {}]   ;;  %s2049_s3 = inlined_call_operand.vmem [shape: f32[64,256], index: 3, kind: output, shape index: {}]  }
   0x1   :  { %v1199_v0 = vld [vmem:[%s2046_s0 + $0x154] ss:$24 sps:$4 sm:$0xff]   ;;  %v1203_v2 = vld [vmem:[%s2046_s0 + $0x150] ss:$24 sps:$4 sm:$0xff]   ;;  %v1205_v4 = vld [vmem:[%s2046_s0 + $0x124] ss:$24 sps:$4 sm:$0xff]   ;;  %1195 = vset.pattern.permute.xlu0 %v1343_v8  ;;  %1196 = vset.pattern.permute.xlu1 %v1343_v8 }
   0x2   :  { %v1201_v1 = vld [vmem:[%s2046_s0 + $0x15c] ss:$24 sps:$4 sm:$0xff]   ;;  %614 = vmatprep.subr.bf16.mxu0 %v1199_v0  ;;  %v1204_v3 = vld [vmem:[%s2046_s0 + $0x158] ss:$24 sps:$4 sm:$0xff]   ;;  %v1207_v5 = vld [vmem:[%s2046_s0 + $0x12c] ss:$24 sps:$4 sm:$0xff]  }
   0x3   :  { %687 = vmatprep.subr.bf16.mxu1 %v1201_v1  ;;  %615 = vmatpush1.bf16.msra.mxu0 %v1203_v2  ;;  %v1209_v6 = vld [vmem:[%s2046_s0 + $0x120] ss:$24 sps:$4 sm:$0xff]   ;;  %v1211_v9 = vld [vmem:[%s2046_s0 + $0xf4] ss:$24 sps:$4 sm:$0xff]   ;;  %v1215_v11 = vld [vmem:[%s2046_s0 + $0xf0] ss:$24 sps:$4 sm:$0xff]  }
   0x4   :  { %688 = vmatpush1.bf16.msra.mxu1 %v1204_v3  ;;  %616 = vmatprep.subr.bf16.mxu0 %v1205_v4  ;;  %v1210_v7 = vld [vmem:[%s2046_s0 + $0x128] ss:$24 sps:$4 sm:$0xff]   ;;  %v1213_v10 = vld [vmem:[%s2046_s0 + $0xfc] ss:$24 sps:$4 sm:$0xff]   ;;  %v1216_v12 = vld [vmem:[%s2046_s0 + $0xf8] ss:$24 sps:$4 sm:$0xff]  }
   0x5   :  { %689 = vmatprep.subr.bf16.mxu1 %v1207_v5  ;;  %v1217_v13 = vld [vmem:[%s2046_s0 + $0xc4] ss:$24 sps:$4 sm:$0xff]   ;;  %v1221_v15 = vld [vmem:[%s2046_s0 + $0xc0] ss:$24 sps:$4 sm:$0xff]   ;;  %v1223_v17 = vld [vmem:[%s2046_s0 + $0x94] ss:$24 sps:$4 sm:$0xff]  }
   0x6   :  { %v1219_v14 = vld [vmem:[%s2046_s0 + $0xcc] ss:$24 sps:$4 sm:$0xff]   ;;  %v1222_v16 = vld [vmem:[%s2046_s0 + $0xc8] ss:$24 sps:$4 sm:$0xff]   ;;  %v1225_v18 = vld [vmem:[%s2046_s0 + $0x9c] ss:$24 sps:$4 sm:$0xff]  }
   0x7   :  { %617 = vmatpush1.bf16.msra.mxu0 %v1209_v6  ;;  %v1227_v19 = vld [vmem:[%s2046_s0 + $0x90] ss:$24 sps:$4 sm:$0xff]   ;;  %v1229_v21 = vld [vmem:[%s2046_s0 + $0x64] ss:$24 sps:$4 sm:$0xff]   ;;  %v1233_v23 = vld [vmem:[%s2046_s0 + $0x60] ss:$24 sps:$4 sm:$0xff]  }
   0x8   :  { %690 = vmatpush1.bf16.msra.mxu1 %v1210_v7  ;;  %618 = vmatprep.subr.bf16.mxu0 %v1211_v9  ;;  %v1228_v20 = vld [vmem:[%s2046_s0 + $0x98] ss:$24 sps:$4 sm:$0xff]   ;;  %v1231_v22 = vld [vmem:[%s2046_s0 + $0x6c] ss:$24 sps:$4 sm:$0xff]   ;;  %v1234_v24 = vld [vmem:[%s2046_s0 + $0x68] ss:$24 sps:$4 sm:$0xff]  }
   0x9   :  { %691 = vmatprep.subr.bf16.mxu1 %v1213_v10  ;;  %v1235_v25 = vld [vmem:[%s2046_s0 + $0x34] ss:$24 sps:$4 sm:$0xff]   ;;  %v1239_v27 = vld [vmem:[%s2046_s0 + $0x30] ss:$24 sps:$4 sm:$0xff]   ;;  %v1241_v29 = vld [vmem:[%s2046_s0 + $0x4] ss:$24 sps:$4 sm:$0xff]  }
   0xa   :  { %v1237_v26 = vld [vmem:[%s2046_s0 + $0x3c] ss:$24 sps:$4 sm:$0xff]   ;;  %v1240_v28 = vld [vmem:[%s2046_s0 + $0x38] ss:$24 sps:$4 sm:$0xff]   ;;  %v1243_v30 = vld [vmem:[%s2046_s0 + $0xc] ss:$24 sps:$4 sm:$0xff]  }
   0xb   :  { %619 = vmatpush1.bf16.msra.mxu0 %v1215_v11  ;;  %v1245_v31 = vld [vmem:[%s2046_s0] ss:$24 sps:$4 sm:$0xff]   ;;  %v1247_v33 = vld [vmem:[%s2046_s0 + $0x2d4] ss:$24 sps:$4 sm:$0xff]   ;;  %v1251_v35 = vld [vmem:[%s2046_s0 + $0x2d0] ss:$24 sps:$4 sm:$0xff]  }
   0xc   :  { %692 = vmatpush1.bf16.msra.mxu1 %v1216_v12  ;;  %620 = vmatprep.subr.bf16.mxu0 %v1217_v13  ;;  %v1246_v32 = vld [vmem:[%s2046_s0 + $0x8] ss:$24 sps:$4 sm:$0xff]   ;;  %v1249_v34 = vld [vmem:[%s2046_s0 + $0x2dc] ss:$24 sps:$4 sm:$0xff]   ;;  %v1252_v36 = vld [vmem:[%s2046_s0 + $0x2d8] ss:$24 sps:$4 sm:$0xff]  }
   0xd   :  { %693 = vmatprep.subr.bf16.mxu1 %v1219_v14  ;;  %v1253_v37 = vld [vmem:[%s2046_s0 + $0x2a4] ss:$24 sps:$4 sm:$0xff]   ;;  %v1257_v39 = vld [vmem:[%s2046_s0 + $0x2a0] ss:$24 sps:$4 sm:$0xff]   ;;  %v1259_v41 = vld [vmem:[%s2046_s0 + $0x274] ss:$24 sps:$4 sm:$0xff]  }
   0xe   :  { %v1255_v38 = vld [vmem:[%s2046_s0 + $0x2ac] ss:$24 sps:$4 sm:$0xff]   ;;  %v1258_v40 = vld [vmem:[%s2046_s0 + $0x2a8] ss:$24 sps:$4 sm:$0xff]   ;;  %v1261_v42 = vld [vmem:[%s2046_s0 + $0x27c] ss:$24 sps:$4 sm:$0xff]  }
   0xf   :  { %621 = vmatpush1.bf16.msra.mxu0 %v1221_v15  ;;  %v1263_v43 = vld [vmem:[%s2046_s0 + $0x270] ss:$24 sps:$4 sm:$0xff]   ;;  %v1265_v45 = vld [vmem:[%s2046_s0 + $0x244] ss:$24 sps:$4 sm:$0xff]   ;;  %v1269_v48 = vld [vmem:[%s2046_s0 + $0x240] ss:$24 sps:$4 sm:$0xff]  }
  0x10   :  { %694 = vmatpush1.bf16.msra.mxu1 %v1222_v16  ;;  %622 = vmatprep.subr.bf16.mxu0 %v1223_v17  ;;  %v1264_v44 = vld [vmem:[%s2046_s0 + $0x278] ss:$24 sps:$4 sm:$0xff]   ;;  %v1267_v46 = vld [vmem:[%s2046_s0 + $0x24c] ss:$24 sps:$4 sm:$0xff]   ;;  %v1270_v49 = vld [vmem:[%s2046_s0 + $0x248] ss:$24 sps:$4 sm:$0xff]  }
  0x11   :  { %695 = vmatprep.subr.bf16.mxu1 %v1225_v18  ;;  %v15_v47 = vld [vmem:[%s2047_s2 + $0x8] sm:$0xff]  ;;  %v17_v50 = vld [vmem:[%s2047_s2 + $0x18] sm:$0xff]  ;;  %v14_v4 = vld [vmem:[%s2047_s2] sm:$0xff] }
  0x12   :  { %v1271_v51 = vld [vmem:[%s2046_s0 + $0x214] ss:$24 sps:$4 sm:$0xff]   ;;  %v1518_v52 = vpack.c.bf16 %v17_v50, %v15_v47  ;;  %v1275_v54 = vld [vmem:[%s2046_s0 + $0x210] ss:$24 sps:$4 sm:$0xff]   ;;  %v1277_v56 = vld [vmem:[%s2046_s0 + $0x1e4] ss:$24 sps:$4 sm:$0xff]  }
  0x13   :  { %623 = vmatpush1.bf16.msra.mxu0 %v1227_v19  ;;  %v1273_v53 = vld [vmem:[%s2046_s0 + $0x21c] ss:$24 sps:$4 sm:$0xff]   ;;  %v1276_v55 = vld [vmem:[%s2046_s0 + $0x218] ss:$24 sps:$4 sm:$0xff]   ;;  %v1279_v57 = vld [vmem:[%s2046_s0 + $0x1ec] ss:$24 sps:$4 sm:$0xff]  }
  0x14   :  { %696 = vmatpush1.bf16.msra.mxu1 %v1228_v20  ;;  %624 = vmatprep.subr.bf16.mxu0 %v1229_v21  ;;  %v1281_v58 = vld [vmem:[%s2046_s0 + $0x1e0] ss:$24 sps:$4 sm:$0xff]   ;;  %v1283_v60 = vld [vmem:[%s2046_s0 + $0x1b4] ss:$24 sps:$4 sm:$0xff]   ;;  %v1287_v62 = vld [vmem:[%s2046_s0 + $0x1b0] ss:$24 sps:$4 sm:$0xff]  }
  0x15   :  { %697 = vmatprep.subr.bf16.mxu1 %v1231_v22  ;;  %646 = vmatprep.mubr.bf16.mxu0 %v1518_v52  ;;  %v1282_v59 = vld [vmem:[%s2046_s0 + $0x1e8] ss:$24 sps:$4 sm:$0xff]   ;;  %v1285_v61 = vld [vmem:[%s2046_s0 + $0x1bc] ss:$24 sps:$4 sm:$0xff]   ;;  %v1288_v63 = vld [vmem:[%s2046_s0 + $0x1b8] ss:$24 sps:$4 sm:$0xff]  }
  0x16   :  { %719 = vmatprep.mubr.bf16.mxu1 %v1518_v52  ;;  %v1289_v0 = vld [vmem:[%s2046_s0 + $0x184] ss:$24 sps:$4 sm:$0xff]   ;;  %v1293_v2 = vld [vmem:[%s2046_s0 + $0x180] ss:$24 sps:$4 sm:$0xff]   ;;  %v16_v5 = vld [vmem:[%s2047_s2 + $0x10] sm:$0xff] }
  0x17   :  { %625 = vmatpush1.bf16.msra.mxu0 %v1233_v23  ;;  %v1291_v1 = vld [vmem:[%s2046_s0 + $0x18c] ss:$24 sps:$4 sm:$0xff]   ;;  %v1294_v3 = vld [vmem:[%s2046_s0 + $0x188] ss:$24 sps:$4 sm:$0xff]   ;;  %v1576_v7 = vpack.c.bf16 %v16_v5, %v14_v4  ;;  %v21_v9 = vld [vmem:[%s2047_s2 + $0x38] sm:$0xff] }
  0x18   :  { %698 = vmatpush1.bf16.msra.mxu1 %v1234_v24  ;;  %626 = vmatprep.subr.bf16.mxu0 %v1235_v25  ;;  %v1297_v6 = vld [vmem:[%s2046_s0 + $0x164] ss:$24 sps:$4 sm:$0xff]   ;;  %v19_v8 = vld [vmem:[%s2047_s2 + $0x28] sm:$0xff]  ;;  %v1295_v10 = vld [vmem:[%s2046_s0 + $0x160] ss:$24 sps:$4 sm:$0xff]  }
  0x19   :  { %699 = vmatprep.subr.bf16.mxu1 %v1237_v26  ;;  %v1300_v11 = vld [vmem:[%s2046_s0 + $0x134] ss:$24 sps:$4 sm:$0xff]   ;;  %v1590_v12 = vpack.c.bf16 %v21_v9, %v19_v8  ;;  %v1298_v13 = vld [vmem:[%s2046_s0 + $0x130] ss:$24 sps:$4 sm:$0xff]   ;;  %v18_v14 = vld [vmem:[%s2047_s2 + $0x20] sm:$0xff] }
  0x1a   :  { %v20_v15 = vld [vmem:[%s2047_s2 + $0x30] sm:$0xff]  ;;  %v1303_v16 = vld [vmem:[%s2046_s0 + $0x104] ss:$24 sps:$4 sm:$0xff]   ;;  %v23_v20 = vld [vmem:[%s2047_s2 + $0x48] sm:$0xff] }
  0x1b   :  { %627 = vmatpush1.bf16.msra.mxu0 %v1239_v27  ;;  %v1609_v17 = vld [vmem:[%s2048_s1] sm:$0xff]  ;;  %v1616_v18 = vld [vmem:[%s2048_s1 + $0x10] sm:$0xff]  ;;  %v1618_v19 = vpack.c.bf16 %v20_v15, %v18_v14  ;;  %v25_v21 = vld [vmem:[%s2047_s2 + $0x58] sm:$0xff] }
  0x1c   :  { %700 = vmatpush1.bf16.msra.mxu1 %v1240_v28  ;;  %628 = vmatprep.subr.bf16.mxu0 %v1241_v29  ;;  %v1301_v22 = vld [vmem:[%s2046_s0 + $0x100] ss:$24 sps:$4 sm:$0xff]   ;;  %v1306_v23 = vld [vmem:[%s2046_s0 + $0xd4] ss:$24 sps:$4 sm:$0xff]   ;;  %v35_v24 = vpack.c.bf16 %v25_v21, %v23_v20  ;;  %v1304_v25 = vld [vmem:[%s2046_s0 + $0xd0] ss:$24 sps:$4 sm:$0xff]  }
  0x1d   :  { %701 = vmatprep.subr.bf16.mxu1 %v1243_v30  ;;  %878 = vperm.xlu0 %1195, %v1609_v17   ;;  %v22_v26 = vld [vmem:[%s2047_s2 + $0x40] sm:$0xff]  ;;  %v24_v27 = vld [vmem:[%s2047_s2 + $0x50] sm:$0xff]  ;;  %v1648_v28 = vld [vmem:[%s2048_s1 + $0x8] sm:$0xff] }
  0x1e   :  { %888 = vperm.xlu1 %1196, %v1616_v18   ;;  %v1653_v29 = vld [vmem:[%s2048_s1 + $0x18] sm:$0xff]  ;;  %v874_v47 = vld [vmem:[%s2048_s1 + $0x30] sm:$0xff] }
  0x1f   :  { %629 = vmatpush1.bf16.msra.mxu0 %v1245_v31  ;;  %v1309_v30 = vld [vmem:[%s2046_s0 + $0xa4] ss:$24 sps:$4 sm:$0xff]   ;;  %v1658_v31 = vpack.c.bf16 %v24_v27, %v22_v26  ;;  %v1319_v50 = vld [vmem:[%s2046_s0 + $0x2e0] ss:$24 sps:$4 sm:$0xff]   ;;  %v849_v27 = vlaneseq }
  0x20   :  { %702 = vmatpush1.bf16.msra.mxu1 %v1246_v32  ;;  %630 = vmatprep.subr.bf16.mxu0 %v1247_v33  ;;  %v27_v32 = vld [vmem:[%s2047_s2 + $0x68] sm:$0xff]  ;;  %v29_v33 = vld [vmem:[%s2047_s2 + $0x78] sm:$0xff] }
  0x21   :  { %703 = vmatprep.subr.bf16.mxu1 %v1249_v34  ;;  %883 = vperm.xlu0 %1195, %v1648_v28   ;;  %v1307_v34 = vld [vmem:[%s2046_s0 + $0xa0] ss:$24 sps:$4 sm:$0xff]  }
  0x22   :  { %893 = vperm.xlu1 %1196, %v1653_v29  }
  0x23   :  { %631 = vmatpush2.bf16.msra.mxu0 %v1251_v35  ;;  %v1312_v35 = vld [vmem:[%s2046_s0 + $0x74] ss:$24 sps:$4 sm:$0xff]  }
  0x24   :  { %704 = vmatpush2.bf16.msra.mxu1 %v1252_v36  ;;  %632 = vmatprep.subr.bf16.mxu0 %v1253_v37  ;;  %v1674_v36 = vpack.c.bf16 %v29_v33, %v27_v32  ;;  %v1310_v37 = vld [vmem:[%s2046_s0 + $0x70] ss:$24 sps:$4 sm:$0xff]  }
  0x25   :  { %705 = vmatprep.subr.bf16.mxu1 %v1255_v38  ;;  %v26_v38 = vld [vmem:[%s2047_s2 + $0x60] sm:$0xff] }
  0x27   :  { %633 = vmatpush2.bf16.msra.mxu0 %v1257_v39  ;;  %v28_v39 = vld [vmem:[%s2047_s2 + $0x70] sm:$0xff] }
  0x28   :  { %706 = vmatpush2.bf16.msra.mxu1 %v1258_v40  ;;  %634 = vmatprep.subr.bf16.mxu0 %v1259_v41  ;;  %v872_v40 = vld [vmem:[%s2048_s1 + $0x20] sm:$0xff]  ;;  %v873_v41 = vld [vmem:[%s2048_s1 + $0x28] sm:$0xff] }
  0x29   :  { %707 = vmatprep.subr.bf16.mxu1 %v1261_v42  ;;  %v1315_v42 = vld [vmem:[%s2046_s0 + $0x44] ss:$24 sps:$4 sm:$0xff]   ;;  %898 = vperm.xlu0 %1195, %v872_v40  }
  0x2a   :  { %903 = vperm.xlu1 %1196, %v873_v41  }
  0x2b   :  { %635 = vmatpush2.bf16.msra.mxu0 %v1263_v43  ;;  %v1698_v43 = vpack.c.bf16 %v28_v39, %v26_v38 }
  0x2c   :  { %708 = vmatpush2.bf16.msra.mxu1 %v1264_v44  ;;  %636 = vmatprep.subr.bf16.mxu0 %v1265_v45  ;;  %v1313_v44 = vld [vmem:[%s2046_s0 + $0x40] ss:$24 sps:$4 sm:$0xff]   ;;  %v1318_v45 = vld [vmem:[%s2046_s0 + $0x14] ss:$24 sps:$4 sm:$0xff]  }
  0x2d   :  { %709 = vmatprep.subr.bf16.mxu1 %v1267_v46  ;;  %v1316_v46 = vld [vmem:[%s2046_s0 + $0x10] ss:$24 sps:$4 sm:$0xff]   ;;  %908 = vperm.xlu0 %1195, %v874_v47  }
  0x2f   :  { %637 = vmatpush2.bf16.msra.mxu0 %v1269_v48  ;;  %v875_v48 = vld [vmem:[%s2048_s1 + $0x38] sm:$0xff] }
  0x30   :  { %710 = vmatpush2.bf16.msra.mxu1 %v1270_v49  ;;  %638 = vmatprep.subr.bf16.mxu0 %v1271_v51  ;;  %v1321_v49 = vld [vmem:[%s2046_s0 + $0x2e4] ss:$24 sps:$4 sm:$0xff]   ;;  %v1324_v51 = vld [vmem:[%s2046_s0 + $0x2b4] ss:$24 sps:$4 sm:$0xff]  }
  0x31   :  { %711 = vmatprep.subr.bf16.mxu1 %v1273_v53  ;;  %913 = vperm.xlu1 %1196, %v875_v48   ;;  %v1344_v53 = vmov 1  }
  0x32   :  { %1197 = vset.pattern.permute.xlu0 %v1344_v53 }
  0x33   :  { %639 = vmatpush2.bf16.msra.mxu0 %v1275_v54  ;;  %v1327_v54 = vld [vmem:[%s2046_s0 + $0x284] ss:$24 sps:$4 sm:$0xff]   ;;  %982 = vperm.xlu0 %1197, %v1609_v17  }
  0x34   :  { %712 = vmatpush2.bf16.msra.mxu1 %v1276_v55  ;;  %640 = vmatprep.subr.bf16.mxu0 %v1277_v56  ;;  %v1325_v55 = vld [vmem:[%s2046_s0 + $0x280] ss:$24 sps:$4 sm:$0xff]   ;;  %v1330_v56 = vld [vmem:[%s2046_s0 + $0x254] ss:$24 sps:$4 sm:$0xff]  }
  0x35   :  { %713 = vmatprep.subr.bf16.mxu1 %v1279_v57  ;;  %1198 = vset.pattern.permute.xlu1 %v1344_v53  ;;  %v1328_v57 = vld [vmem:[%s2046_s0 + $0x250] ss:$24 sps:$4 sm:$0xff]  }
  0x36   :  { %986 = vperm.xlu1 %1198, %v1648_v28  }
  0x37   :  { %641 = vmatpush2.bf16.msra.mxu0 %v1281_v58  ;;  %994 = vperm.xlu0 %1197, %v1653_v29   ;;  %v1333_v58 = vld [vmem:[%s2046_s0 + $0x224] ss:$24 sps:$4 sm:$0xff]  }
  0x38   :  { %714 = vmatpush2.bf16.msra.mxu1 %v1282_v59  ;;  %642 = vmatprep.subr.bf16.mxu0 %v1283_v60  ;;  %v1331_v59 = vld [vmem:[%s2046_s0 + $0x220] ss:$24 sps:$4 sm:$0xff]   ;;  %v1336_v60 = vld [vmem:[%s2046_s0 + $0x1f4] ss:$24 sps:$4 sm:$0xff]  }
  0x39   :  { %715 = vmatprep.subr.bf16.mxu1 %v1285_v61  ;;  %v1334_v61 = vld [vmem:[%s2046_s0 + $0x1f0] ss:$24 sps:$4 sm:$0xff]  }
  0x3a   :  { %990 = vperm.xlu1 %1198, %v1616_v18  }
  0x3b   :  { %643 = vmatpush2.bf16.msra.mxu0 %v1287_v62  ;;  %1002 = vperm.xlu0 %1197, %v873_v41   ;;  %v1339_v62 = vld [vmem:[%s2046_s0 + $0x1c4] ss:$24 sps:$4 sm:$0xff]  }
  0x3c   :  { %716 = vmatpush2.bf16.msra.mxu1 %v1288_v63  ;;  %644 = vmatprep.subr.bf16.mxu0 %v1289_v0  ;;  %v1337_v63 = vld [vmem:[%s2046_s0 + $0x1c0] ss:$24 sps:$4 sm:$0xff]   ;;  %v1342_v0 = vld [vmem:[%s2046_s0 + $0x194] ss:$24 sps:$4 sm:$0xff]  }
  0x3d   :  { %717 = vmatprep.subr.bf16.mxu1 %v1291_v1  ;;  %v1340_v1 = vld [vmem:[%s2046_s0 + $0x190] ss:$24 sps:$4 sm:$0xff]  }
  0x3e   :  { %998 = vperm.xlu1 %1198, %v872_v40  }
  0x3f   :  { %645 = vmatpush2.bf16.msra.mxu0 %v1293_v2  ;;  %1010 = vperm.xlu0 %1197, %v875_v48  }
  0x40   :  { %718 = vmatpush2.bf16.msra.mxu1 %v1294_v3  ;;  %760 = vmatprep.subr.bf16.mxu0 %v1297_v6 }
  0x41   :  { %1161 = vmatprep.subr.bf16.mxu1 %v1297_v6 }
  0x42   :  { %647 = vmatmul.mubr.bf16.vlgmr.msra.gmra.mxu0 %v1576_v7  ;;  %1006 = vperm.xlu1 %1198, %v874_v47  }
  0x43   :  { %720 = vmatmul.mubr.bf16.vlgmr.msra.gmra.mxu1 %v1576_v7  ;;  %761 = vmatpush1.bf16.msra.mxu0 %v1295_v10 }
  0x44   :  { %1177 = vmatpush1.bf16.msra.mxu1 %v1295_v10  ;;  %762 = vmatprep.subr.bf16.mxu0 %v1300_v11 }
  0x45   :  { %1162 = vmatprep.subr.bf16.mxu1 %v1300_v11  ;;  %656 = vmatprep.mubr.bf16.mxu0 %v1590_v12 }
  0x46   :  { %729 = vmatprep.mubr.bf16.mxu1 %v1590_v12 }
  0x47   :  { %763 = vmatpush1.bf16.msra.mxu0 %v1298_v13 }
  0x48   :  { %1178 = vmatpush1.bf16.msra.mxu1 %v1298_v13  ;;  %764 = vmatprep.subr.bf16.mxu0 %v1303_v16 }
  0x49   :  { %1163 = vmatprep.subr.bf16.mxu1 %v1303_v16 }
  0x4a   :  { %657 = vmatmul.mubr.bf16.gmra.mxu0 %v1618_v19 }
  0x4b   :  { %730 = vmatmul.mubr.bf16.gmra.mxu1 %v1618_v19  ;;  %765 = vmatpush1.bf16.msra.mxu0 %v1301_v22 }
  0x4c   :  { %1179 = vmatpush1.bf16.msra.mxu1 %v1301_v22  ;;  %766 = vmatprep.subr.bf16.mxu0 %v1306_v23 }
  0x4d   :  { %1164 = vmatprep.subr.bf16.mxu1 %v1306_v23  ;;  %666 = vmatprep.mubr.bf16.mxu0 %v35_v24 }
  0x4e   :  { %739 = vmatprep.mubr.bf16.mxu1 %v35_v24 }
  0x4f   :  { %767 = vmatpush1.bf16.msra.mxu0 %v1304_v25 }
  0x50   :  { %1180 = vmatpush1.bf16.msra.mxu1 %v1304_v25  ;;  %768 = vmatprep.subr.bf16.mxu0 %v1309_v30 }
  0x51   :  { %1165 = vmatprep.subr.bf16.mxu1 %v1309_v30 }
  0x52   :  { %667 = vmatmul.mubr.bf16.gmra.mxu0 %v1658_v31 }
  0x53   :  { %740 = vmatmul.mubr.bf16.gmra.mxu1 %v1658_v31  ;;  %769 = vmatpush1.bf16.msra.mxu0 %v1307_v34 }
  0x54   :  { %1181 = vmatpush1.bf16.msra.mxu1 %v1307_v34  ;;  %770 = vmatprep.subr.bf16.mxu0 %v1312_v35 }
  0x55   :  { %1166 = vmatprep.subr.bf16.mxu1 %v1312_v35  ;;  %676 = vmatprep.mubr.bf16.mxu0 %v1674_v36 }
  0x56   :  { %749 = vmatprep.mubr.bf16.mxu1 %v1674_v36 }
  0x57   :  { %771 = vmatpush1.bf16.msra.mxu0 %v1310_v37 }
  0x58   :  { %1182 = vmatpush1.bf16.msra.mxu1 %v1310_v37  ;;  %772 = vmatprep.subr.bf16.mxu0 %v1315_v42 }
  0x59   :  { %1167 = vmatprep.subr.bf16.mxu1 %v1315_v42 }
  0x5a   :  { %677 = vmatmul.mubr.bf16.gmra.mxu0 %v1698_v43 }
  0x5b   :  { %750 = vmatmul.mubr.bf16.gmra.mxu1 %v1698_v43  ;;  %773 = vmatpush1.bf16.msra.mxu0 %v1313_v44 }
  0x5c   :  { %1183 = vmatpush1.bf16.msra.mxu1 %v1313_v44  ;;  %774 = vmatprep.subr.bf16.mxu0 %v1318_v45 }
  0x5d   :  { %1168 = vmatprep.subr.bf16.mxu1 %v1318_v45  ;;  %792 = vmatprep.mubr.bf16.mxu0 %v1518_v52  ;;  %v1322_v52 = vld [vmem:[%s2046_s0 + $0x2b0] ss:$24 sps:$4 sm:$0xff]  }
  0x5e   :  { %812 = vmatprep.mubr.bf16.mxu1 %v35_v24 }
  0x5f   :  { %775 = vmatpush1.bf16.msra.mxu0 %v1316_v46 }
  0x60   :  { %1184 = vmatpush1.bf16.msra.mxu1 %v1316_v46  ;;  %776 = vmatprep.subr.bf16.mxu0 %v1321_v49 }
  0x61   :  { %1169 = vmatprep.subr.bf16.mxu1 %v1321_v49 }
  0x63   :  { %777 = vmatpush2.bf16.msra.mxu0 %v1319_v50 }
  0x64   :  { %1185 = vmatpush2.bf16.msra.mxu1 %v1319_v50  ;;  %778 = vmatprep.subr.bf16.mxu0 %v1324_v51 }
  0x65   :  { %1170 = vmatprep.subr.bf16.mxu1 %v1324_v51 }
  0x67   :  { %779 = vmatpush2.bf16.msra.mxu0 %v1322_v52 }
  0x68   :  { %1186 = vmatpush2.bf16.msra.mxu1 %v1322_v52  ;;  %780 = vmatprep.subr.bf16.mxu0 %v1327_v54 }
  0x69   :  { %1171 = vmatprep.subr.bf16.mxu1 %v1327_v54 }
  0x6b   :  { %781 = vmatpush2.bf16.msra.mxu0 %v1325_v55 }
  0x6c   :  { %1187 = vmatpush2.bf16.msra.mxu1 %v1325_v55  ;;  %782 = vmatprep.subr.bf16.mxu0 %v1330_v56 }
  0x6d   :  { %1172 = vmatprep.subr.bf16.mxu1 %v1330_v56 }
  0x6f   :  { %783 = vmatpush2.bf16.msra.mxu0 %v1328_v57 }
  0x70   :  { %1188 = vmatpush2.bf16.msra.mxu1 %v1328_v57  ;;  %784 = vmatprep.subr.bf16.mxu0 %v1333_v58 }
  0x71   :  { %1173 = vmatprep.subr.bf16.mxu1 %v1333_v58 }
  0x73   :  { %785 = vmatpush2.bf16.msra.mxu0 %v1331_v59 }
  0x74   :  { %1189 = vmatpush2.bf16.msra.mxu1 %v1331_v59  ;;  %786 = vmatprep.subr.bf16.mxu0 %v1336_v60 }
  0x75   :  { %1174 = vmatprep.subr.bf16.mxu1 %v1336_v60 }
  0x77   :  { %787 = vmatpush2.bf16.msra.mxu0 %v1334_v61 }
  0x78   :  { %1190 = vmatpush2.bf16.msra.mxu1 %v1334_v61  ;;  %788 = vmatprep.subr.bf16.mxu0 %v1339_v62 }
  0x79   :  { %1175 = vmatprep.subr.bf16.mxu1 %v1339_v62 }
  0x7b   :  { %789 = vmatpush2.bf16.msra.mxu0 %v1337_v63 }
  0x7c   :  { %1191 = vmatpush2.bf16.msra.mxu1 %v1337_v63  ;;  %790 = vmatprep.subr.bf16.mxu0 %v1342_v0 }
  0x7d   :  { %1176 = vmatprep.subr.bf16.mxu1 %v1342_v0 }
  0x7f   :  { %791 = vmatpush2.bf16.msra.mxu0 %v1340_v1 }
  0x80   :  { %1192 = vmatpush2.bf16.msra.mxu1 %v1340_v1 }
  0x82   :  { %793 = vmatmul.mubr.bf16.vlgmr.msra.gmra.mxu0 %v1576_v7 }
  0x83   :  { %813 = vmatmul.mubr.bf16.vlgmr.msra.gmra.mxu1 %v1658_v31  ;;  %802 = vmatprep.mubr.bf16.mxu0 %v1590_v12  ;;  %v1818_v31 = vshrl.u32 %v849_v27, 7 }
  0x84   :  { %822 = vmatprep.mubr.bf16.mxu1 %v1674_v36 }
  0x85   :  { %vm851_vm0 = vcmp.lt.s32.totalorder %v1818_v31, 1  ;;  %vm964_vm1 = vcmp.lt.s32.totalorder %v1818_v31, 7 }
  0x8a   :  { %803 = vmatmul.mubr.bf16.gmra.mxu0 %v1618_v19 }
  0x8b   :  { %823 = vmatmul.mubr.bf16.gmra.mxu1 %v1698_v43 }
  0x98   :  { %v1810_v26 = vpop.permute.xlu0 %878 }
  0x99   :  { %v1804_v23 = vpop.permute.xlu1 %888 }
  0x9c   :  { %v884_v32 = vpop.permute.xlu0 %883 }
  0x9d   :  { %v1812_v28 = vpop.permute.xlu1 %893 }
  0xa4   :  { %v899_v40 = vpop.permute.xlu0 %898 }
  0xa5   :  { %v904_v33 = vpop.permute.xlu1 %903 }
  0xa8   :  { %v909_v55 = vpop.permute.xlu0 %908 }
  0xac   :  { %v1827_v41 = vpop.permute.xlu1 %913 }
  0xb1   :  { %v1847_v0 = vpop.permute.xlu1 %986 }
 0x102   :  { %v1776_v2 = vpop.f32.mrf.mxu0 }
 0x103   :  { %v1780_v4 = vpop.f32.mrf.mxu1  ;;  %v833_v38 = vrot.slane %v1776_v2, 7 }
 0x104   :  { %v1778_v3 = vpop.f32.mrf.mxu0 }
 0x105   :  { %v1782_v6 = vpop.f32.mrf.mxu1  ;;  %v834_v42 = vrot.slane %v1778_v3, 7 }
 0x106   :  { %v652_v5 = vpop.f32.mrf.mxu0 }
 0x107   :  { %v1786_v8 = vpop.f32.mrf.mxu1  ;;  %v835_v36 = vrot.slane %v652_v5, 7 }
 0x108   :  { %v1784_v7 = vpop.f32.mrf.mxu0 }
 0x109   :  { %v1788_v10 = vpop.f32.mrf.mxu1  ;;  %v836_v37 = vrot.slane %v1784_v7, 7  ;;  %v864_v45 = vsel %vm851_vm0, %v833_v38, %v835_v36 }
 0x10a   :  { %v658_v9 = vpop.f32.mrf.mxu0  ;;  %v918_v56 = vmul.f32 %v884_v32, %v864_v45 }
 0x10b   :  { %v1792_v12 = vpop.f32.mrf.mxu1  ;;  %v837_v39 = vrot.slane %v658_v9, 7  ;;  %v865_v48 = vsel %vm851_vm0, %v834_v42, %v836_v37 }
 0x10c   :  { %v1790_v11 = vpop.f32.mrf.mxu0  ;;  %v919_v60 = vmul.f32 %v884_v32, %v865_v48 }
 0x10d   :  { %v1794_v14 = vpop.f32.mrf.mxu1  ;;  %v838_v53 = vrot.slane %v1790_v11, 7  ;;  %v862_v52 = vsel %vm851_vm0, %v835_v36, %v837_v39  ;;  %v1872_v36 = vadd.f32 %v918_v56, %v1786_v8 }
 0x10e   :  { %v662_v13 = vpop.f32.mrf.mxu0  ;;  %v920_v1 = vmul.f32 %v1804_v23, %v862_v52 }
 0x10f   :  { %v1796_v16 = vpop.f32.mrf.mxu1  ;;  %v839_v46 = vrot.slane %v662_v13, 7  ;;  %v863_v7 = vsel %vm851_vm0, %v836_v37, %v838_v53  ;;  %v1875_v37 = vadd.f32 %v919_v60, %v1788_v10 }
 0x110   :  { %v664_v15 = vpop.f32.mrf.mxu0 }
 0x111   :  { %v1798_v18 = vpop.f32.mrf.mxu1  ;;  %v840_v57 = vrot.slane %v664_v15, 7  ;;  %v860_v62 = vsel %vm851_vm0, %v837_v39, %v839_v46  ;;  %v1861_v15 = vpop.permute.xlu0 %982  ;;  %v1878_v39 = vmul.f32 %v1804_v23, %v863_v7 }
 0x112   :  { %v668_v17 = vpop.f32.mrf.mxu0 }
 0x113   :  { %v1800_v20 = vpop.f32.mrf.mxu1  ;;  %v841_v47 = vrot.slane %v668_v17, 7  ;;  %v861_v17 = vsel %vm851_vm0, %v838_v53, %v840_v57 }
 0x114   :  { %v670_v19 = vpop.f32.mrf.mxu0 }
 0x115   :  { %v1802_v22 = vpop.f32.mrf.mxu1  ;;  %v842_v49 = vrot.slane %v670_v19, 7  ;;  %v858_v63 = vsel %vm851_vm0, %v839_v46, %v841_v47  ;;  %v922_v19 = vmul.f32 %v1812_v28, %v860_v62  ;;  %v1914_v52 = vpop.permute.xlu0 %994 }
 0x116   :  { %v672_v21 = vpop.f32.mrf.mxu0 }
 0x117   :  { %v1808_v25 = vpop.f32.mrf.mxu1  ;;  %v843_v50 = vrot.slane %v672_v21, 7  ;;  %v859_v2 = vsel %vm851_vm0, %v840_v57, %v842_v49  ;;  %v924_v21 = vmul.f32 %v899_v40, %v858_v63  ;;  %v1900_v48 = vadd.f32 %v922_v19, %v1796_v16 }
 0x118   :  { %v1806_v24 = vpop.f32.mrf.mxu0 }
 0x119   :  { %v1816_v30 = vpop.f32.mrf.mxu1  ;;  %v844_v51 = vrot.slane %v1806_v24, 7  ;;  %v856_v3 = vsel %vm851_vm0, %v841_v47, %v843_v50  ;;  %v1885_v47 = vadd.f32 %v920_v1, %v1792_v12  ;;  %v940_v12 = vadd.f32 %v924_v21, %v1800_v20  ;;  %v1003_v19 = vpop.permute.xlu0 %1002 }
 0x11a   :  { %v1814_v29 = vpop.f32.mrf.mxu0  ;;  %v926_v32 = vmul.f32 %v904_v33, %v856_v3 }
 0x11b   :  { %v1822_v35 = vpop.f32.mrf.mxu1  ;;  %v845_v54 = vrot.slane %v1814_v29, 7  ;;  %v857_v5 = vsel %vm851_vm0, %v842_v49, %v844_v51  ;;  %v925_v29 = vmul.f32 %v899_v40, %v859_v2  ;;  %v1897_v40 = vmul.f32 %v1812_v28, %v861_v17 }
 0x11c   :  { %v1820_v34 = vpop.f32.mrf.mxu0 }
 0x11d   :  { %v1830_v44 = vpop.f32.mrf.mxu1  ;;  %v846_v9 = vrot.slane %v1820_v34, 7  ;;  %v854_v13 = vsel %vm851_vm0, %v843_v50, %v845_v54  ;;  %v927_v34 = vmul.f32 %v904_v33, %v857_v5  ;;  %v941_v50 = vadd.f32 %v925_v29, %v1802_v22 }
 0x11e   :  { %v682_v43 = vpop.f32.mrf.mxu0 }
 0x11f   :  { %v1841_v59 = vpop.f32.mrf.mxu1  ;;  %v847_v61 = vrot.slane %v682_v43, 7  ;;  %v928_v43 = vmul.f32 %v909_v55, %v854_v13  ;;  %v855_v8 = vsel %vm851_vm0, %v844_v51, %v846_v9  ;;  %v942_v51 = vadd.f32 %v926_v32, %v1808_v25 }
 0x120   :  { %v684_v58 = vpop.f32.mrf.mxu0  ;;  %v1910_v53 = vadd.f32 %v927_v34, %v1816_v30 }
 0x121   :  { %v848_v11 = vrot.slane %v684_v58, 7  ;;  %v1866_v24 = vpop.f32.mrf.mxu1  ;;  %v866_v27 = vsel %vm851_vm0, %v847_v61, %v833_v38  ;;  %v852_v10 = vsel %vm851_vm0, %v845_v54, %v847_v61  ;;  %v1893_v38 = vpop.permute.xlu1 %990  ;;  %v1917_v54 = vmul.f32 %v909_v55, %v855_v8 }
 0x122   :  { %v916_v23 = vmul.f32 %v1810_v26, %v866_v27  ;;  %v1920_v20 = vadd.f32 %v928_v43, %v1822_v35  ;;  %v930_v56 = vmul.f32 %v1827_v41, %v852_v10 }
 0x123   :  { %v867_v33 = vsel %vm851_vm0, %v848_v11, %v834_v42  ;;  %v853_v28 = vsel %vm851_vm0, %v846_v9, %v848_v11 }
 0x124   :  { %v917_v16 = vmul.f32 %v1810_v26, %v867_v33  ;;  %v932_v61 = vadd.f32 %v916_v23, %v1780_v4  ;;  %v1927_v62 = vmul.f32 %v1827_v41, %v853_v28  ;;  %v1937_v41 = vadd.f32 %v930_v56, %v1841_v59 }
 0x125   :  { %v999_v1 = vpop.permute.xlu1 %998 }
 0x126   :  { %v933_v4 = vadd.f32 %v917_v16, %v1782_v6 }
 0x142   :  { %v1880_v45 = vpop.f32.mrf.mxu0 }
 0x143   :  { %v1882_v46 = vpop.f32.mrf.mxu1  ;;  %v948_v25 = vrot.slane %v1880_v45, 1 }
 0x144   :  { %v1903_v49 = vpop.f32.mrf.mxu0  ;;  %v956_v30 = vrot.slane %v1882_v46, 1 }
 0x145   :  { %v1905_v42 = vpop.f32.mrf.mxu1  ;;  %v949_v26 = vrot.slane %v1903_v49, 1 }
 0x146   :  { %v798_v22 = vpop.f32.mrf.mxu0  ;;  %v957_v35 = vrot.slane %v1905_v42, 1  ;;  %v945_v42 = vadd.f32 %v1917_v54, %v1830_v44 }
 0x147   :  { %v818_v57 = vpop.f32.mrf.mxu1  ;;  %v950_v58 = vrot.slane %v798_v22, 1 }
 0x148   :  { %v958_v60 = vrot.slane %v818_v57, 1  ;;  %v800_v55 = vpop.f32.mrf.mxu0 }
 0x149   :  { %v820_v63 = vpop.f32.mrf.mxu1  ;;  %v977_v2 = vsel %vm964_vm1, %v948_v25, %v950_v58  ;;  %v951_v5 = vrot.slane %v800_v55, 1 }
 0x14a   :  { %v969_v3 = vsel %vm964_vm1, %v956_v30, %v958_v60  ;;  %v959_v7 = vrot.slane %v820_v63, 1  ;;  %v1013_v9 = vmul.f32 %v1861_v15, %v977_v2  ;;  %v804_v13 = vpop.f32.mrf.mxu0 }
 0x14b   :  { %v1021_v11 = vmul.f32 %v999_v1, %v969_v3  ;;  %v824_v17 = vpop.f32.mrf.mxu1  ;;  %v978_v21 = vsel %vm964_vm1, %v949_v26, %v951_v5  ;;  %v952_v6 = vrot.slane %v804_v13, 1 }
 0x14c   :  { %v970_v27 = vsel %vm964_vm1, %v957_v35, %v959_v7  ;;  %v960_v29 = vrot.slane %v824_v17, 1  ;;  %v1029_v59 = vadd.f32 %v1013_v9, %v932_v61  ;;  %v1014_v34 = vmul.f32 %v1861_v15, %v978_v21  ;;  %v806_v45 = vpop.f32.mrf.mxu0 }
 0x14d   :  { %v1037_v32 = vadd.f32 %v1021_v11, %v940_v12  ;;  %v1022_v43 = vmul.f32 %v999_v1, %v970_v27  ;;  %v826_v46 = vpop.f32.mrf.mxu1  ;;  %v975_v33 = vsel %vm964_vm1, %v950_v58, %v952_v6  ;;  %v953_v10 = vrot.slane %v806_v45, 1  ;;  %v1007_v11 = vpop.permute.xlu1 %1006 }
 0x14e   :  { %v967_v8 = vsel %vm964_vm1, %v958_v60, %v960_v29  ;;  %v961_v23 = vrot.slane %v826_v46, 1  ;;  %1045 = vst [vmem:[%s2049_s3] sm:$0xff] %v1029_v59  ;;  %v1030_v15 = vadd.f32 %v1014_v34, %v933_v4  ;;  %v1015_v28 = vmul.f32 %v1847_v0, %v975_v33  ;;  %v808_v56 = vpop.f32.mrf.mxu0 }
 0x14f   :  { %1053 = vst [vmem:[%s2049_s3 + $0x40] sm:$0xff] %v1037_v32  ;;  %v1038_v12 = vadd.f32 %v1022_v43, %v941_v50  ;;  %v1023_v16 = vmul.f32 %v1003_v19, %v967_v8  ;;  %v828_v22 = vpop.f32.mrf.mxu1  ;;  %v976_v57 = vsel %vm964_vm1, %v951_v5, %v953_v10  ;;  %v954_v60 = vrot.slane %v808_v56, 1 }
 0x150   :  { %v968_v58 = vsel %vm964_vm1, %v959_v7, %v961_v23  ;;  %v962_v61 = vrot.slane %v828_v22, 1  ;;  %1046 = vst [vmem:[%s2049_s3 + $0x8] sm:$0xff] %v1030_v15  ;;  %v1031_v50 = vadd.f32 %v1015_v28, %v1872_v36  ;;  %v1016_v63 = vmul.f32 %v1847_v0, %v976_v57  ;;  %v810_v2 = vpop.f32.mrf.mxu0  ;;  %v1011_v36 = vpop.permute.xlu0 %1010 }
 0x151   :  { %1054 = vst [vmem:[%s2049_s3 + $0x48] sm:$0xff] %v1038_v12  ;;  %v1039_v55 = vadd.f32 %v1023_v16, %v942_v51  ;;  %v1024_v1 = vmul.f32 %v1003_v19, %v968_v58  ;;  %v830_v3 = vpop.f32.mrf.mxu1  ;;  %v971_v5 = vsel %vm964_vm1, %v954_v60, %v956_v30  ;;  %v973_v7 = vsel %vm964_vm1, %v952_v6, %v954_v60 }
 0x152   :  { %v965_v4 = vsel %vm964_vm1, %v960_v29, %v962_v61  ;;  %v979_v9 = vsel %vm964_vm1, %v962_v61, %v948_v25  ;;  %1047 = vst [vmem:[%s2049_s3 + $0x10] sm:$0xff] %v1031_v50  ;;  %v1032_v0 = vadd.f32 %v1016_v63, %v1875_v37  ;;  %v1017_v30 = vmul.f32 %v1893_v38, %v973_v7 }
 0x153   :  { %1055 = vst [vmem:[%s2049_s3 + $0x50] sm:$0xff] %v1039_v55  ;;  %v1040_v51 = vadd.f32 %v1024_v1, %v1910_v53  ;;  %v1019_v13 = vmul.f32 %v1914_v52, %v971_v5  ;;  %v1025_v17 = vmul.f32 %v1007_v11, %v965_v4  ;;  %v1027_v25 = vmul.f32 %v1011_v36, %v979_v9 }
 0x154   :  { %v955_v19 = vrot.slane %v810_v2, 1  ;;  %v963_v21 = vrot.slane %v830_v3, 1  ;;  %v937_v27 = vadd.f32 %v1878_v39, %v1794_v14  ;;  %v939_v6 = vadd.f32 %v1897_v40, %v1798_v18  ;;  %1048 = vst [vmem:[%s2049_s3 + $0x18] sm:$0xff] %v1032_v0 }
 0x155   :  { %1056 = vst [vmem:[%s2049_s3 + $0x58] sm:$0xff] %v1040_v51  ;;  %v1033_v37 = vadd.f32 %v1017_v30, %v1885_v47  ;;  %v1035_v53 = vadd.f32 %v1019_v13, %v1900_v48  ;;  %v1041_v29 = vadd.f32 %v1025_v17, %v1920_v20  ;;  %v1043_v59 = vadd.f32 %v1027_v25, %v1937_v41 }
 0x156   :  { %v972_v14 = vsel %vm964_vm1, %v955_v19, %v957_v35  ;;  %v974_v18 = vsel %vm964_vm1, %v953_v10, %v955_v19  ;;  %v966_v40 = vsel %vm964_vm1, %v961_v23, %v963_v21  ;;  %v980_v48 = vsel %vm964_vm1, %v963_v21, %v949_v26 }
 0x157   :  { %1049 = vst [vmem:[%s2049_s3 + $0x20] sm:$0xff] %v1033_v37  ;;  %1051 = vst [vmem:[%s2049_s3 + $0x30] sm:$0xff] %v1035_v53  ;;  %v1018_v39 = vmul.f32 %v1893_v38, %v974_v18  ;;  %v1020_v47 = vmul.f32 %v1914_v52, %v972_v14  ;;  %v947_v20 = vadd.f32 %v1927_v62, %v1866_v24 }
 0x158   :  { %1057 = vst [vmem:[%s2049_s3 + $0x60] sm:$0xff] %v1041_v29  ;;  %1059 = vst [vmem:[%s2049_s3 + $0x70] sm:$0xff] %v1043_v59  ;;  %v1026_v38 = vmul.f32 %v1007_v11, %v966_v40  ;;  %v1028_v52 = vmul.f32 %v1011_v36, %v980_v48 }
 0x159   :  { %v1034_v49 = vadd.f32 %v1018_v39, %v937_v27  ;;  %v1036_v35 = vadd.f32 %v1020_v47, %v939_v6 }
 0x15a   :  { %v1042_v31 = vadd.f32 %v1026_v38, %v945_v42  ;;  %v1044_v26 = vadd.f32 %v1028_v52, %v947_v20 }
 0x15b   :  { %1050 = vst [vmem:[%s2049_s3 + $0x28] sm:$0xff] %v1034_v49  ;;  %1052 = vst [vmem:[%s2049_s3 + $0x38] sm:$0xff] %v1036_v35 }
 0x15c   :  { %1058 = vst [vmem:[%s2049_s3 + $0x68] sm:$0xff] %v1042_v31  ;;  %1060 = vst [vmem:[%s2049_s3 + $0x78] sm:$0xff] %v1044_v26 }

</bundles_post_ra>
